<compile_context>
chip_gen: v7x
topology: tpu7x:2x2x1
jax: 0.10.0
libtpu: 0.0.40
codegen_flags: <defaults>
</compile_context>

<pallas_src>
import jax
import jax.numpy as jnp
from jax.experimental import pallas as pl
from jax.experimental.pallas import tpu as pltpu


def _linear_relu_kernel(w_ref, b_ref, x_ref, o_ref):
    """w_ref: VMEM (F_in, F_out); b_ref: VMEM (1, F_out);
    x_ref: VMEM (tb, F_in) row block; o_ref: VMEM (tb, F_out) row block."""
    # MXU matmul with f32 accumulation; bias + ReLU on the VPU; one combined store.
    y = jnp.dot(
        x_ref[...],
        w_ref[...],
        preferred_element_type=jnp.float32,
        precision=jax.lax.Precision.HIGHEST,
    )
    o_ref[...] = jnp.maximum(y + b_ref[...], 0.0).astype(o_ref.dtype)


def _round_up(x, m):
    return ((x + m - 1) // m) * m


def _pick_row_tile(B, tb_max):
    """Row tile: multiple of 8 (sublane granularity), capped at tb_max; for large
    batches keep >= 4 grid steps so the 'parallel' axis can shard across both
    TensorCores on v7x (no effect on v5e/v6e)."""
    tb = min(tb_max, _round_up(B, 8))
    if B >= 4096:
        tb = min(tb, _round_up(pl.cdiv(B, 4), 8))
    return max(8, _round_up(tb, 8))


def logistic_regression_forward(x, w, b, *, tb_max=8192):
    """x: (B, 7) f32, w: (7, 3) f32 (in, out layout), b: (3,) f32 -> (B, 3) f32."""
    B, F_in = x.shape
    F_out = w.shape[1]
    b2 = b.reshape(1, F_out)

    tb = _pick_row_tile(B, tb_max)
    # Ragged last block is fine: OOB reads are unused, OOB writes are masked.
    grid = (pl.cdiv(B, tb),)

    return pl.pallas_call(
        _linear_relu_kernel,
        out_shape=jax.ShapeDtypeStruct((B, F_out), x.dtype),
        grid=grid,
        in_specs=[
            pl.BlockSpec((F_in, F_out), lambda i: (0, 0)),   # w: resident, fetched once
            pl.BlockSpec((1, F_out), lambda i: (0, 0)),      # b: resident, fetched once
            pl.BlockSpec((tb, F_in), lambda i: (i, 0)),      # x: contiguous row tile
        ],
        out_specs=pl.BlockSpec((tb, F_out), lambda i: (i, 0)),
        compiler_params=pltpu.CompilerParams(
            dimension_semantics=("parallel",),          # megacore sharding on v7x
            vmem_limit_bytes=32 * 1024 * 1024,          # lane-padded (tb,7)/(tb,3) tiles
        ),
    )(w, b2, x)


def init_params(key):
    """Deterministic init matching nn.Linear(7, 3) default (U(-1/sqrt(7), 1/sqrt(7)))."""
    k_w, k_b = jax.random.split(key)
    bound = 1.0 / jnp.sqrt(7.0)
    # PyTorch stores weight as (out, in); we keep the transposed (in, out) layout.
    w = jax.random.uniform(k_w, (7, 3), jnp.float32, minval=-bound, maxval=bound)
    b = jax.random.uniform(k_b, (3,), jnp.float32, minval=-bound, maxval=bound)
    return w, b


def _reference(x, w, b):
    y = jnp.dot(x, w, precision=jax.lax.Precision.HIGHEST) + b
    return jnp.maximum(y, 0.0)


if __name__ == "__main__":
    key = jax.random.PRNGKey(0)
    k_x, k_p, k_x2 = jax.random.split(key, 3)
    w, b = init_params(k_p)

    # Case 1: tiny batch (typical DQN use) -> single grid step, no wrapper ops.
    batch = 8
    x = jax.random.normal(k_x, (batch, 7), jnp.float32)
    out = jax.block_until_ready(logistic_regression_forward(x, w, b))
    ref = _reference(x, w, b)
    assert out.shape == (batch, 3)
    assert jnp.allclose(out, ref, atol=1e-5, rtol=1e-5)

    # Case 2: batch not a multiple of the tile -> multi-step grid + masked ragged block.
    batch2 = 300
    x2 = jax.random.normal(k_x2, (batch2, 7), jnp.float32)
    out2 = jax.block_until_ready(
        logistic_regression_forward(x2, w, b, tb_max=128))
    ref2 = _reference(x2, w, b)
    assert out2.shape == (batch2, 3)
    assert jnp.allclose(out2, ref2, atol=1e-5, rtol=1e-5)

    print("KERNEL_OK")
</pallas_src>

<mosaic_0001>
module attributes {stable_mosaic.version = 11 : i64} {
  func.func @_linear_relu_kernel(%arg0: i32, %arg1: memref<7x3xf32, #tpu.memory_space<vmem>>, %arg2: memref<1x3xf32, #tpu.memory_space<vmem>>, %arg3: memref<8x7xf32, #tpu.memory_space<vmem>>, %arg4: memref<8x3xf32, #tpu.memory_space<vmem>>) attributes {dimension_semantics = [#tpu.dimension_semantics<parallel>], iteration_bounds = array<i64: 1>, scalar_prefetch = 0 : i64, scratch_operands = 0 : i64, tpu.core_type = #tpu.core_type<tc>, window_params = [{pipeline_mode = #tpu.pipeline_mode<synchronous>, transform_indices = @transform_0, window_bounds = array<i64: 7, 3>}, {pipeline_mode = #tpu.pipeline_mode<synchronous>, transform_indices = @transform_1, window_bounds = array<i64: 1, 3>}, {transform_indices = @transform_2, window_bounds = array<i64: 8, 7>}, {transform_indices = @transform_3, window_bounds = array<i64: 8, 3>}]} {
    %c0 = arith.constant 0 : index
    %c0_0 = arith.constant 0 : index
    %0 = vector.load %arg3[%c0, %c0_0] : memref<8x7xf32, #tpu.memory_space<vmem>>, vector<8x7xf32>
    %c0_1 = arith.constant 0 : index
    %c0_2 = arith.constant 0 : index
    %1 = vector.load %arg1[%c0_1, %c0_2] : memref<7x3xf32, #tpu.memory_space<vmem>>, vector<7x3xf32>
    %cst = arith.constant dense<0.000000e+00> : vector<8x3xf32>
    %2 = tpu.matmul %0, %1, %cst {dimension_numbers = #tpu.dot_dimension_numbers<[1], [0], [0], [1], [0, 0, 1, 1], [], []>, precision = #tpu.contract_precision<fp32>} : vector<8x7xf32>, vector<7x3xf32>, vector<8x3xf32> -> vector<8x3xf32>
    %c0_3 = arith.constant 0 : index
    %c0_4 = arith.constant 0 : index
    %3 = vector.load %arg2[%c0_3, %c0_4] : memref<1x3xf32, #tpu.memory_space<vmem>>, vector<1x3xf32>
    %4 = vector.broadcast %3 : vector<1x3xf32> to vector<8x3xf32>
    %5 = arith.addf %2, %4 : vector<8x3xf32>
    %cst_5 = arith.constant 0.000000e+00 : f32
    %6 = vector.broadcast %cst_5 : f32 to vector<8x3xf32>
    %7 = arith.maximumf %5, %6 : vector<8x3xf32>
    %c0_6 = arith.constant 0 : index
    %c0_7 = arith.constant 0 : index
    %8 = vector.load %arg4[%c0_6, %c0_7] : memref<8x3xf32, #tpu.memory_space<vmem>>, vector<8x3xf32>
    tpu.vector_store %arg4[%c0_6, %c0_7], %7 {strides = array<i32>} : memref<8x3xf32, #tpu.memory_space<vmem>>, vector<8x3xf32>,
    return
  }
  func.func @transform_0(%arg0: i32) -> (i32, i32) {
    %c0_i32 = arith.constant 0 : i32
    %c0_i32_0 = arith.constant 0 : i32
    %c0_i32_1 = arith.constant 0 : i32
    return %c0_i32, %c0_i32_0 : i32, i32
  }
  func.func @transform_1(%arg0: i32) -> (i32, i32) {
    %c0_i32 = arith.constant 0 : i32
    %c0_i32_0 = arith.constant 0 : i32
    %c0_i32_1 = arith.constant 0 : i32
    return %c0_i32, %c0_i32_0 : i32, i32
  }
  func.func @transform_2(%arg0: i32) -> (i32, i32) {
    %c0_i32 = arith.constant 0 : i32
    %c0_i32_0 = arith.constant 0 : i32
    return %arg0, %c0_i32 : i32, i32
  }
  func.func @transform_3(%arg0: i32) -> (i32, i32) {
    %c0_i32 = arith.constant 0 : i32
    %c0_i32_0 = arith.constant 0 : i32
    return %arg0, %c0_i32 : i32, i32
  }
}

</mosaic_0001>

<bundles_post_ra>
// kernel: tpu_custom_call.1
= control target key start
LH: loop header
LB: loop body
LE: loop exit
PB: predicated region body
PF: predicated region fallthrough
CT: control target
= control target key end

     0   :  { %vm27_vm0 = vcmask 1046528   ;;  %vm23_vm1 = vcmask 56320   ;;  %v539_v0 = vmov 0.0   ;;  %vm540_vm2 = vmmov 0   ;;  %s579_s0 = inlined_call_operand.vmem [shape: f32[7,3], index: 0, kind: input, shape index: {}]   ;;  %s580_s2 = inlined_call_operand.vmem [shape: f32[8,7], index: 2, kind: input, shape index: {}]   ;;  %s581_s1 = inlined_call_operand.vmem [shape: f32[1,3], index: 1, kind: input, shape index: {}]   ;;  %s582_s3 = inlined_call_operand.vmem [shape: f32[8,3], index: 3, kind: output, shape index: {}]  }
   0x1   :  { %512 = vmatprep.subr.mxu0 %v539_v0  ;;  %v15_v1 = vld [vmem:[%s579_s0] sm:$0x7f]  ;;  %514 = vmatprep.mubr.msk.f32.mxu0 %vm540_vm2, %v539_v0  ;;  %vm478_vm3 = vcmask 23552  }
   0x2   :  { %v14_v2 = vld [vmem:[%s580_s2] sm:$0xff]  ;;  %v29_v3 = vsel %vm27_vm0, %v15_v1, 0  ;;  %497 = vmatprep.subr.mxu1 %v539_v0  ;;  %499 = vmatprep.mubr.msk.f32.mxu1 %vm540_vm2, %v539_v0 }
   0x3   :  { %v25_v4 = vsel %vm23_vm1, %v14_v2, 0  ;;  %v32_v5 = vand.u32 4294901760, %v29_v3  ;;  %v484_v17 = vld [vmem:[%s581_s1] ss:$0 sm:$0xff] }
   0x4   :  { %v97_v6 = vand.u32 4294901760, %v25_v4 }
   0x5   :  { %v109_v7 = vsub.f32 %v29_v3, %v32_v5  ;;  %513 = vmatpush3.msra.mxu0 %v32_v5  ;;  %498 = vmatpush3.msra.mxu1 %v32_v5 }
   0x6   :  { %v98_v8 = vsub.f32 %v25_v4, %v97_v6  ;;  %502 = vmatprep.subr.mxu1 %v539_v0  ;;  %517 = vmatprep.subr.mxu0 %v539_v0 }
   0x7   :  { %v110_v10 = vand.u32 4294901760, %v109_v7 }
   0x8   :  { %v99_v9 = vand.u32 4294901760, %v98_v8 }
   0x9   :  { %v111_v12 = vsub.f32 %v109_v7, %v110_v10 }
   0xa   :  { %515 = vmatmul.mubr.f32.vlgmr.msra.gmra.mrb[0].mxu0 %v99_v9  ;;  %v100_v11 = vsub.f32 %v98_v8, %v99_v9 }
   0xb   :  { %518 = vmatpush3.msra.mxu0 %v110_v10  ;;  %519 = vmatprep.mubr.msk.f32.mxu0 %vm540_vm2, %v539_v0  ;;  %v112_v14 = vand.u32 4294901760, %v111_v12 }
   0xc   :  { %v101_v13 = vand.u32 4294901760, %v100_v11  ;;  %522 = vmatprep.subr.mxu0 %v539_v0 }
   0xe   :  { %500 = vmatmul.mubr.f32.vlgmr.msra.gmra.mrb[0].mxu1 %v101_v13 }
   0xf   :  { %503 = vmatpush3.msra.mxu1 %v112_v14  ;;  %504 = vmatprep.mubr.msk.f32.mxu1 %vm540_vm2, %v539_v0 }
  0x10   :  { %507 = vmatprep.subr.mxu1 %v539_v0 }
  0x12   :  { %520 = vmatmul.mubr.f32.vlgmr.msra.gmra.mrb[0].mxu0 %v97_v6 }
  0x13   :  { %523 = vmatpush3.msra.mxu0 %v32_v5  ;;  %524 = vmatprep.mubr.msk.f32.mxu0 %vm540_vm2, %v539_v0 }
  0x16   :  { %505 = vmatmul.mubr.f32.vlgmr.msra.gmra.mrb[0].mxu1 %v97_v6 }
  0x17   :  { %508 = vmatpush3.msra.mxu1 %v109_v7  ;;  %509 = vmatprep.mubr.msk.f32.mxu1 %vm540_vm2, %v539_v0 }
  0x1a   :  { %525 = vmatmul.mubr.f32.vlgmr.msra.gmra.mrb[0].mxu0 %v97_v6 }
  0x1e   :  { %510 = vmatmul.mubr.f32.vlgmr.msra.gmra.mrb[0].mxu1 %v98_v8 }
  0xed   :  { %v473_v15 = vpop.f32.mrb[0].mxu0 }
  0xee   :  { %v526_v16 = vpop.f32.mrb[1].mxu0 }
  0xf1   :  { %v253_v18 = vpop.f32.mrb[0].mxu1 }
  0xf2   :  { %v527_v19 = vadd.f32 %v484_v17, %v253_v18  ;;  %v511_v20 = vpop.f32.mrb[1].mxu1 }
  0xf4   :  { %v528_v21 = vadd.f32 %v527_v19, %v473_v15 }
  0xf6   :  { %v477_v22 = vmax.f32 %v528_v21, 0.0 }
  0xf8   :  { %479 = vst.msk [vmem:[%s582_s3] sm:$0xff] %vm478_vm3, %v477_v22 }

</bundles_post_ra>
